<compile_context>
chip_gen: v5e
topology: v5e:2x2
jax: 0.10.0
libtpu: 0.0.40
codegen_flags: <defaults>
</compile_context>

<pallas_src>
import jax
import jax.numpy as jnp
from jax.experimental import pallas as pl
from jax.experimental.pallas import tpu as pltpu


def _local_attention_kernel(ctx_ref, w_in_t_ref, att_row_ref, w_out_t_ref,
                            out_ref, wts_ref):
    # ctx_ref:     (TB, L, D)  TB batch rows
    # w_in_t_ref:  (D, 2D)     linear_in weight, pre-transposed
    # att_row_ref: (1, 2D)     attention vector as a row
    # w_out_t_ref: (2D, D)     linear_out weight, pre-transposed
    # out_ref:     (TB, D)     attended output (post tanh)
    # wts_ref:     (TB, L)     attention weights
    TB, L, D = ctx_ref.shape
    D2 = w_in_t_ref.shape[1]

    # linear_in as one big MXU matmul: [TB*L, D] @ [D, 2D] -> [TB*L, 2D]
    ctx2 = ctx_ref[...].reshape(TB * L, D)
    proj = jnp.dot(ctx2, w_in_t_ref[...],
                   preferred_element_type=jnp.float32)          # [TB*L, 2D]
    proj3 = proj.reshape(TB, L, D2)                              # [TB, L, 2D]

    # attention scores on the VPU (avoid an N=1 MXU matmul):
    # scores[b, l] = sum_k proj[b, l, k] * att[k]
    att = att_row_ref[...]                                       # (1, 2D)
    scores = jnp.sum(proj3 * att, axis=-1)                       # [TB, L]

    # masked_softmax: T[T == 0] = -10 ^ 20  (== -30 due to Python XOR),
    # softmax over the query-length axis.
    scores = jnp.where(scores == 0.0, jnp.float32(-30.0), scores)
    m = jnp.max(scores, axis=-1, keepdims=True)                  # [TB, 1]
    e = jnp.exp(scores - m)
    weights = e / jnp.sum(e, axis=-1, keepdims=True)             # [TB, L]

    # mix[b, k] = sum_l weights[b, l] * proj[b, l, k]  (VPU mul + sublane reduce,
    # avoids a batched M=1 matmul)
    mix = jnp.sum(weights[:, :, None] * proj3, axis=1)           # [TB, 2D]

    # linear_out + tanh: [TB, 2D] @ [2D, D] -> [TB, D]
    out = jnp.tanh(jnp.dot(mix, w_out_t_ref[...],
                           preferred_element_type=jnp.float32))

    out_ref[...] = out.astype(out_ref.dtype)
    wts_ref[...] = weights.astype(wts_ref.dtype)


def local_attention(context, att_vec, w_in, w_out, *, tb=None):
    """
    context: [B, L, D] float32
    att_vec: [2D, 1]   float32
    w_in:    [2D, D]   float32   (linear_in.weight, PyTorch [out, in])
    w_out:   [D, 2D]   float32   (linear_out.weight, PyTorch [out, in])
    Returns (output [B, D], attention_weights [B, L]).
    """
    B, L, D = context.shape
    D2 = 2 * D

    # One-time layout plumbing (outside the kernel): transpose weights and
    # reshape the attention vector to a row.
    w_in_t = jnp.transpose(w_in)            # (D, 2D)
    w_out_t = jnp.transpose(w_out)          # (2D, D)
    att_row = jnp.reshape(att_vec, (1, D2))  # (1, 2D)

    # Batch-tile size: multiple of 8 (sublane), capped at 128.
    if tb is None:
        tb = min(128, max(8, ((B + 7) // 8) * 8))
    n_tiles = (B + tb - 1) // tb
    b_pad = n_tiles * tb

    ctx = context
    if b_pad != B:
        ctx = jnp.pad(context, ((0, b_pad - B), (0, 0), (0, 0)))

    grid_spec = pltpu.PrefetchScalarGridSpec(
        num_scalar_prefetch=0,
        grid=(n_tiles,),
        in_specs=[
            pl.BlockSpec((tb, L, D), lambda b: (b, 0, 0)),   # context tile
            pl.BlockSpec((D, D2), lambda b: (0, 0)),         # linear_in.T
            pl.BlockSpec((1, D2), lambda b: (0, 0)),         # att_vec row
            pl.BlockSpec((D2, D), lambda b: (0, 0)),         # linear_out.T
        ],
        out_specs=[
            pl.BlockSpec((tb, D), lambda b: (b, 0)),         # output
            pl.BlockSpec((tb, L), lambda b: (b, 0)),         # attention weights
        ],
    )

    out, wts = pl.pallas_call(
        _local_attention_kernel,
        out_shape=(
            jax.ShapeDtypeStruct((b_pad, D), jnp.float32),
            jax.ShapeDtypeStruct((b_pad, L), jnp.float32),
        ),
        grid_spec=grid_spec,
        compiler_params=pltpu.CompilerParams(
            dimension_semantics=("parallel",)),
    )(ctx, w_in_t, att_row, w_out_t)

    return out[:B], wts[:B]


def local_attention_ref(context, att_vec, w_in, w_out):
    """Pure-JAX reference mirroring the PyTorch forward."""
    B, L, D = context.shape
    proj = context.reshape(B * L, D) @ w_in.T                  # [B*L, 2D]
    proj = proj.reshape(B, L, 2 * D)
    scores = proj @ att_vec                                    # [B, L, 1]
    scores = jnp.where(scores == 0.0, -30.0, scores)
    weights = jax.nn.softmax(scores, axis=1)                   # [B, L, 1]
    mix = jnp.matmul(jnp.swapaxes(weights, 1, 2), proj)        # [B, 1, 2D]
    mix = mix.reshape(B, 2 * D)
    out = jnp.tanh(mix @ w_out.T)                              # [B, D]
    return out, weights.reshape(B, L)


if __name__ == "__main__":
    B, L, D = 2, 8, 32

    key = jax.random.PRNGKey(0)
    k_ctx, k_att, k_win, k_wout = jax.random.split(key, 4)

    context = jax.random.normal(k_ctx, (B, L, D), dtype=jnp.float32)
    att_vec = jax.random.normal(k_att, (2 * D, 1), dtype=jnp.float32)
    # Deterministic "Kaiming-uniform-like" init for the two Linear layers.
    w_in = jax.random.uniform(k_win, (2 * D, D), dtype=jnp.float32,
                              minval=-(D ** -0.5), maxval=D ** -0.5)
    w_out = jax.random.uniform(k_wout, (D, 2 * D), dtype=jnp.float32,
                               minval=-((2 * D) ** -0.5), maxval=(2 * D) ** -0.5)

    out, wts = local_attention(context, att_vec, w_in, w_out)
    out, wts = jax.block_until_ready(out), jax.block_until_ready(wts)

    out_ref, wts_ref = local_attention_ref(context, att_vec, w_in, w_out)
    assert jnp.allclose(out, out_ref, atol=1e-5, rtol=1e-5), "output mismatch"
    assert jnp.allclose(wts, wts_ref, atol=1e-5, rtol=1e-5), "weights mismatch"

    print("KERNEL_OK")
</pallas_src>

<mosaic_0001>
module attributes {stable_mosaic.version = 11 : i64} {
  func.func @_local_attention_kernel(%arg0: i32, %arg1: memref<8x8x32xf32, #tpu.memory_space<vmem>>, %arg2: memref<32x64xf32, #tpu.memory_space<vmem>>, %arg3: memref<1x64xf32, #tpu.memory_space<vmem>>, %arg4: memref<64x32xf32, #tpu.memory_space<vmem>>, %arg5: memref<8x32xf32, #tpu.memory_space<vmem>>, %arg6: memref<8x8xf32, #tpu.memory_space<vmem>>) attributes {dimension_semantics = [#tpu.dimension_semantics<parallel>], iteration_bounds = array<i64: 1>, scalar_prefetch = 0 : i64, scratch_operands = 0 : i64, tpu.core_type = #tpu.core_type<tc>, window_params = [{transform_indices = @transform_0, window_bounds = array<i64: 8, 8, 32>}, {pipeline_mode = #tpu.pipeline_mode<synchronous>, transform_indices = @transform_1, window_bounds = array<i64: 32, 64>}, {pipeline_mode = #tpu.pipeline_mode<synchronous>, transform_indices = @transform_2, window_bounds = array<i64: 1, 64>}, {pipeline_mode = #tpu.pipeline_mode<synchronous>, transform_indices = @transform_3, window_bounds = array<i64: 64, 32>}, {transform_indices = @transform_4, window_bounds = array<i64: 8, 32>}, {transform_indices = @transform_5, window_bounds = array<i64: 8, 8>}]} {
    %c0 = arith.constant 0 : index
    %c0_0 = arith.constant 0 : index
    %c0_1 = arith.constant 0 : index
    %0 = vector.load %arg1[%c0, %c0_0, %c0_1] : memref<8x8x32xf32, #tpu.memory_space<vmem>>, vector<8x8x32xf32>
    %1 = vector.shape_cast %0 : vector<8x8x32xf32> to vector<64x32xf32>
    %c0_2 = arith.constant 0 : index
    %c0_3 = arith.constant 0 : index
    %2 = vector.load %arg2[%c0_2, %c0_3] : memref<32x64xf32, #tpu.memory_space<vmem>>, vector<32x64xf32>
    %cst = arith.constant dense<0.000000e+00> : vector<64x64xf32>
    %3 = tpu.matmul %1, %2, %cst {dimension_numbers = #tpu.dot_dimension_numbers<[1], [0], [0], [1], [0, 0, 1, 1], [], []>} : vector<64x32xf32>, vector<32x64xf32>, vector<64x64xf32> -> vector<64x64xf32>
    %4 = vector.shape_cast %3 : vector<64x64xf32> to vector<8x8x64xf32>
    %c0_4 = arith.constant 0 : index
    %c0_5 = arith.constant 0 : index
    %5 = vector.load %arg3[%c0_4, %c0_5] : memref<1x64xf32, #tpu.memory_space<vmem>>, vector<1x64xf32>
    %6 = vector.shape_cast %5 : vector<1x64xf32> to vector<1x1x64xf32>
    %7 = vector.broadcast %6 : vector<1x1x64xf32> to vector<8x8x64xf32>
    %8 = arith.mulf %4, %7 : vector<8x8x64xf32>
    %cst_6 = arith.constant dense<0.000000e+00> : vector<8x8xf32>
    %9 = vector.multi_reduction <add>, %8, %cst_6 [2] : vector<8x8x64xf32> to vector<8x8xf32>
    %cst_7 = arith.constant 0.000000e+00 : f32
    %10 = vector.broadcast %cst_7 : f32 to vector<8x8xf32>
    %11 = arith.cmpf oeq, %9, %10 : vector<8x8xf32>
    %cst_8 = arith.constant -3.000000e+01 : f32
    %12 = vector.broadcast %cst_8 : f32 to vector<8x8xf32>
    %13 = arith.select %11, %12, %9 : vector<8x8xi1>, vector<8x8xf32>
    %cst_9 = arith.constant dense<0xFF800000> : vector<8xf32>
    %14 = vector.multi_reduction <maximumf>, %13, %cst_9 [1] : vector<8x8xf32> to vector<8xf32>
    %15 = vector.shape_cast %14 : vector<8xf32> to vector<8x1xf32>
    %16 = vector.broadcast %15 : vector<8x1xf32> to vector<8x8xf32>
    %17 = arith.subf %13, %16 : vector<8x8xf32>
    %18 = math.exp %17 : vector<8x8xf32>
    %cst_10 = arith.constant dense<0.000000e+00> : vector<8xf32>
    %19 = vector.multi_reduction <add>, %18, %cst_10 [1] : vector<8x8xf32> to vector<8xf32>
    %20 = vector.shape_cast %19 : vector<8xf32> to vector<8x1xf32>
    %21 = vector.broadcast %20 : vector<8x1xf32> to vector<8x8xf32>
    %22 = arith.divf %18, %21 : vector<8x8xf32>
    %23 = vector.shape_cast %22 : vector<8x8xf32> to vector<8x8x1xf32>
    %24 = vector.broadcast %23 : vector<8x8x1xf32> to vector<8x8x64xf32>
    %25 = arith.mulf %24, %4 : vector<8x8x64xf32>
    %cst_11 = arith.constant dense<0.000000e+00> : vector<8x64xf32>
    %26 = vector.multi_reduction <add>, %25, %cst_11 [1] : vector<8x8x64xf32> to vector<8x64xf32>
    %c0_12 = arith.constant 0 : index
    %c0_13 = arith.constant 0 : index
    %27 = vector.load %arg4[%c0_12, %c0_13] : memref<64x32xf32, #tpu.memory_space<vmem>>, vector<64x32xf32>
    %cst_14 = arith.constant dense<0.000000e+00> : vector<8x32xf32>
    %28 = tpu.matmul %26, %27, %cst_14 {dimension_numbers = #tpu.dot_dimension_numbers<[1], [0], [0], [1], [0, 0, 1, 1], [], []>} : vector<8x64xf32>, vector<64x32xf32>, vector<8x32xf32> -> vector<8x32xf32>
    %29 = math.tanh %28 : vector<8x32xf32>
    %c0_15 = arith.constant 0 : index
    %c0_16 = arith.constant 0 : index
    %30 = vector.load %arg5[%c0_15, %c0_16] : memref<8x32xf32, #tpu.memory_space<vmem>>, vector<8x32xf32>
    tpu.vector_store %arg5[%c0_15, %c0_16], %29 {strides = array<i32>} : memref<8x32xf32, #tpu.memory_space<vmem>>, vector<8x32xf32>,
    %c0_17 = arith.constant 0 : index
    %c0_18 = arith.constant 0 : index
    %31 = vector.load %arg6[%c0_17, %c0_18] : memref<8x8xf32, #tpu.memory_space<vmem>>, vector<8x8xf32>
    tpu.vector_store %arg6[%c0_17, %c0_18], %22 {strides = array<i32>} : memref<8x8xf32, #tpu.memory_space<vmem>>, vector<8x8xf32>,
    return
  }
  func.func @transform_0(%arg0: i32) -> (i32, i32, i32) {
    %c0_i32 = arith.constant 0 : i32
    %c0_i32_0 = arith.constant 0 : i32
    %c0_i32_1 = arith.constant 0 : i32
    return %arg0, %c0_i32, %c0_i32_0 : i32, i32, i32
  }
  func.func @transform_1(%arg0: i32) -> (i32, i32) {
    %c0_i32 = arith.constant 0 : i32
    %c0_i32_0 = arith.constant 0 : i32
    %c0_i32_1 = arith.constant 0 : i32
    return %c0_i32, %c0_i32_0 : i32, i32
  }
  func.func @transform_2(%arg0: i32) -> (i32, i32) {
    %c0_i32 = arith.constant 0 : i32
    %c0_i32_0 = arith.constant 0 : i32
    %c0_i32_1 = arith.constant 0 : i32
    return %c0_i32, %c0_i32_0 : i32, i32
  }
  func.func @transform_3(%arg0: i32) -> (i32, i32) {
    %c0_i32 = arith.constant 0 : i32
    %c0_i32_0 = arith.constant 0 : i32
    %c0_i32_1 = arith.constant 0 : i32
    return %c0_i32, %c0_i32_0 : i32, i32
  }
  func.func @transform_4(%arg0: i32) -> (i32, i32) {
    %c0_i32 = arith.constant 0 : i32
    %c0_i32_0 = arith.constant 0 : i32
    return %arg0, %c0_i32 : i32, i32
  }
  func.func @transform_5(%arg0: i32) -> (i32, i32) {
    %c0_i32 = arith.constant 0 : i32
    %c0_i32_0 = arith.constant 0 : i32
    return %arg0, %c0_i32 : i32, i32
  }
}

</mosaic_0001>

<bundles_post_ra>
// kernel: tpu_custom_call.1
= control target key start
LH: loop header
LB: loop body
LE: loop exit
PB: predicated region body
PF: predicated region fallthrough
CT: control target
= control target key end

     0   :  { %11 = vsyncpa [#allocation3], 0  ;;  %s1079_s0 = inlined_call_operand.vmem [shape: f32[8,8,32], index: 0, kind: input, shape index: {}]   ;;  %s1080_s1 = inlined_call_operand.vmem [shape: f32[32,64], index: 1, kind: input, shape index: {}]   ;;  %s1081_s2 = inlined_call_operand.vmem [shape: f32[1,64], index: 2, kind: input, shape index: {}]   ;;  %s1082_s3 = inlined_call_operand.vmem [shape: f32[64,32], index: 3, kind: input, shape index: {}]   ;;  %s1083_s4 = inlined_call_operand.hbm [shape: f32[8,32], index: 4, kind: output, shape index: {0}]   ;;  %s1084_s5 = inlined_call_operand.hbm [shape: f32[8,8], index: 5, kind: output, shape index: {1}]  }
   0x1   :  { %v32_v0 = vld [vmem:[%s1080_s1 + $0x18] sm:$0xff]  ;;  %v31_v1 = vld [vmem:[%s1080_s1 + $0x10] sm:$0xff]  ;;  %v30_v2 = vld [vmem:[%s1080_s1 + $0x8] sm:$0xff] }
   0x2   :  { %70 = vmatpush.msra.mxu0 %v32_v0  ;;  %627 = vmatpush.msra.mxu2 %v32_v0  ;;  %v29_v3 = vld [vmem:[%s1080_s1] sm:$0xff] }
   0x3   :  { %628 = vmatpush.msra.mxu3 %v32_v0 }
   0x4   :  { %71 = vmatpush.msra.mxu0 %v31_v1  ;;  %629 = vmatpush.msra.mxu2 %v31_v1 }
   0x5   :  { %630 = vmatpush.msra.mxu3 %v31_v1 }
   0x6   :  { %12 = vsyncpa [#allocation5], 0  ;;  %72 = vmatpush.msra.mxu0 %v30_v2  ;;  %631 = vmatpush.msra.mxu2 %v30_v2  ;;  %v21_v4 = vld [vmem:[%s1079_s0] sm:$0xff]  ;;  %vm1085_vm0 = vcmask 261120   ;;  %v24_v5 = vld [vmem:[%s1079_s0 + $0x18] sm:$0xff]  ;;  %vm111_vm1 = vcmask 523264   ;;  %v160_v40 = vlaneseq }
   0x7   :  { %632 = vmatpush.msra.mxu3 %v30_v2  ;;  %v27_v6 = vld [vmem:[%s1079_s0 + $0x30] sm:$0xff]  ;;  %v22_v7 = vld [vmem:[%s1079_s0 + $0x8] sm:$0xff]  ;;  %v25_v8 = vld [vmem:[%s1079_s0 + $0x20] sm:$0xff]  ;;  %vm170_vm5 = vcmask 1041409   ;;  %vm172_vm6 = vcmask 1042434   ;;  %vm174_vm10 = vcmask 1043459  }
   0x8   :  { %73 = vmatpush.msra.mxu0 %v29_v3  ;;  %633 = vmatpush.msra.mxu2 %v29_v3  ;;  %v28_v9 = vld [vmem:[%s1079_s0 + $0x38] sm:$0xff]  ;;  %v23_v10 = vld [vmem:[%s1079_s0 + $0x10] sm:$0xff]  ;;  %v26_v11 = vld [vmem:[%s1079_s0 + $0x28] sm:$0xff]  ;;  %v840_v42 = vand.u32 127, %v160_v40  ;;  %vm176_vm12 = vcmask 1044484   ;;  %vm178_vm13 = vcmask 1045509  }
   0x9   :  { %618 = vmatmul.msk.f32.vlgmr.msra.gmra.mxu0 %vm1085_vm0, %v21_v4  ;;  %621 = vmatmul.msk.f32.vlgmr.msra.gmra.mxu2 %vm1085_vm0, %v24_v5  ;;  %v641_v12 = vld [vmem:[%s1081_s2] ss:$0 sm:$0xff]  ;;  %vm1088_vm15 = vcmask 1046534   ;;  %s604_s9 = sshll.u32 %s1084_s5, 4  ;;  %s730_s10 = smov [#allocation2]   ;;  %s605_s9 = int_to_ptr.hbm [resolvable:$true] %s604_s9 }
   0xa   :  { %634 = vmatpush.msra.mxu3 %v29_v3  ;;  %s591_s11 = sshll.u32 %s730_s10, 4  ;;  %s593_s14 = sshll.u32 %s1083_s4, 4  ;;  %s592_s11 = int_to_ptr.vmem [resolvable:$true] %s591_s11  ;;  %s594_s14 = int_to_ptr.hbm [resolvable:$true] %s593_s14 }
   0xb   :  { %624 = vmatmul.msk.f32.vlgmr.msra.gmra.mxu3 %vm1085_vm0, %v27_v6 }
  0x11   :  { %619 = vmatmul.msk.f32.gmra.mxu0 %vm1085_vm0, %v22_v7  ;;  %622 = vmatmul.msk.f32.gmra.mxu2 %vm1085_vm0, %v25_v8  ;;  %v728_v7 = vmov 0  }
  0x12   :  { %640 = vset.pattern.permute.xlu2 %v728_v7  ;;  %639 = vset.pattern.permute.xlu1 %v728_v7 }
  0x13   :  { %625 = vmatmul.msk.f32.gmra.mxu3 %vm1085_vm0, %v28_v9  ;;  %638 = vset.pattern.permute.xlu0 %v728_v7 }
  0x19   :  { %620 = vmatmul.msk.f32.gmra.mxu0 %vm1085_vm0, %v23_v10  ;;  %623 = vmatmul.msk.f32.gmra.mxu2 %vm1085_vm0, %v26_v11 }
  0x86   :  { %v808_v13 = vpop.f32.mrf.mxu0 }
  0x87   :  { %v103_v14 = vmul.f32 %v641_v12, %v808_v13 }
  0x89   :  { %v112_v15 = vsel %vm111_vm1, %v103_v14, 0.0 }
  0x8a   :  { %113 = vadd.xlane.f32.xlu0 %v112_v15 }
  0x8c   :  { %v812_v16 = vpop.f32.mrf.mxu2 }
  0x8d   :  { %v106_v17 = vmul.f32 %v641_v12, %v812_v16 }
  0x8e   :  { %v815_v18 = vpop.f32.mrf.mxu0  ;;  %v817_v19 = vpop.f32.mrf.mxu3 }
  0x8f   :  { %v104_v20 = vmul.f32 %v641_v12, %v815_v18  ;;  %v121_v21 = vsel %vm111_vm1, %v106_v17, 0.0  ;;  %v109_v23 = vmul.f32 %v641_v12, %v817_v19 }
  0x90   :  { %122 = vadd.xlane.f32.xlu1 %v121_v21 }
  0x91   :  { %v115_v22 = vsel %vm111_vm1, %v104_v20, 0.0  ;;  %v130_v29 = vsel %vm111_vm1, %v109_v23, 0.0 }
  0x92   :  { %116 = vadd.xlane.f32.xlu0 %v115_v22 }
  0x94   :  { %v823_v24 = vpop.f32.mrf.mxu2 }
  0x95   :  { %v107_v25 = vmul.f32 %v641_v12, %v823_v24 }
  0x96   :  { %v826_v26 = vpop.f32.mrf.mxu0  ;;  %v831_v30 = vpop.f32.mrf.mxu3 }
  0x97   :  { %v105_v27 = vmul.f32 %v641_v12, %v826_v26  ;;  %v124_v28 = vsel %vm111_vm1, %v107_v25, 0.0  ;;  %v110_v32 = vmul.f32 %v641_v12, %v831_v30 }
  0x98   :  { %125 = vadd.xlane.f32.xlu2 %v124_v28 }
  0x99   :  { %v118_v31 = vsel %vm111_vm1, %v105_v27, 0.0  ;;  %v133_v36 = vsel %vm111_vm1, %v110_v32, 0.0 }
  0x9a   :  { %131 = vadd.xlane.f32.xlu0 %v130_v29  ;;  %119 = vadd.xlane.f32.xlu1 %v118_v31 }
  0x9c   :  { %v835_v33 = vpop.f32.mrf.mxu2 }
  0x9d   :  { %v108_v34 = vmul.f32 %v641_v12, %v835_v33 }
  0x9f   :  { %v127_v35 = vsel %vm111_vm1, %v108_v34, 0.0 }
  0xa0   :  { %128 = vadd.xlane.f32.xlu2 %v127_v35 }
  0xa2   :  { %134 = vadd.xlane.f32.xlu1 %v133_v36 }
  0xfd   :  { %v114_v37 = vpop.xlane.xlu0 %113 }
  0xfe   :  { %vm136_vm3 = vcmp.eq.f32.partialorder %v114_v37, 0.0 }
  0xff   :  { %v144_v44 = vsel %vm136_vm3, -30.0, %v114_v37  ;;  %vm1086_vm3 = vcmask 64512  }
 0x100   :  { %v162_v48 = vperm.slane %v144_v44, %v840_v42 }
 0x103   :  { %v123_v38 = vpop.xlane.xlu1 %122 }
 0x104   :  { %vm139_vm4 = vcmp.eq.f32.partialorder %v123_v38, 0.0 }
 0x105   :  { %v117_v39 = vpop.xlane.xlu0 %116  ;;  %v147_v49 = vsel %vm139_vm4, -30.0, %v123_v38 }
 0x106   :  { %vm137_vm2 = vcmp.eq.f32.partialorder %v117_v39, 0.0  ;;  %v165_v53 = vperm.slane %v147_v49, %v840_v42 }
 0x107   :  { %v145_v41 = vsel %vm137_vm2, -30.0, %v117_v39  ;;  %vm1087_vm2 = vcmask 1047559  }
 0x108   :  { %v163_v45 = vperm.slane %v145_v41, %v840_v42 }
 0x10a   :  { %v171_v52 = vsel %vm170_vm5, %v163_v45, %v162_v48 }
 0x10b   :  { %v126_v43 = vpop.xlane.xlu2 %125 }
 0x10c   :  { %vm140_vm8 = vcmp.eq.f32.partialorder %v126_v43, 0.0 }
 0x10d   :  { %v120_v46 = vpop.xlane.xlu1 %119  ;;  %v132_v47 = vpop.xlane.xlu0 %131  ;;  %v148_v54 = vsel %vm140_vm8, -30.0, %v126_v43 }
 0x10e   :  { %vm138_vm7 = vcmp.eq.f32.partialorder %v120_v46, 0.0  ;;  %vm142_vm9 = vcmp.eq.f32.partialorder %v132_v47, 0.0  ;;  %v166_v59 = vperm.slane %v148_v54, %v840_v42 }
 0x10f   :  { %v146_v50 = vsel %vm138_vm7, -30.0, %v120_v46  ;;  %v150_v57 = vsel %vm142_vm9, -30.0, %v132_v47 }
 0x110   :  { %v164_v51 = vperm.slane %v146_v50, %v840_v42  ;;  %v168_v63 = vperm.slane %v150_v57, %v840_v42 }
 0x112   :  { %v173_v55 = vsel %vm172_vm6, %v164_v51, %v171_v52 }
 0x113   :  { %v129_v56 = vpop.xlane.xlu2 %128  ;;  %v175_v58 = vsel %vm174_vm10, %v165_v53, %v173_v55 }
 0x114   :  { %vm141_vm11 = vcmp.eq.f32.partialorder %v129_v56, 0.0  ;;  %v177_v1 = vsel %vm176_vm12, %v166_v59, %v175_v58 }
 0x115   :  { %v149_v60 = vsel %vm141_vm11, -30.0, %v129_v56  ;;  %v135_v61 = vpop.xlane.xlu1 %134 }
 0x116   :  { %v167_v62 = vperm.slane %v149_v60, %v840_v42  ;;  %vm143_vm14 = vcmp.eq.f32.partialorder %v135_v61, 0.0 }
 0x117   :  { %v151_v0 = vsel %vm143_vm14, -30.0, %v135_v61 }
 0x118   :  { %v169_v2 = vperm.slane %v151_v0, %v840_v42  ;;  %v179_v3 = vsel %vm178_vm13, %v167_v62, %v177_v1 }
 0x119   :  { %v181_v4 = vsel %vm1088_vm15, %v168_v63, %v179_v3 }
 0x11a   :  { %v183_v5 = vsel %vm1087_vm2, %v169_v2, %v181_v4 }
 0x11b   :  { %v186_v6 = vsel %vm1086_vm3, %v183_v5, -inf }
 0x11c   :  { %187 = vmax.xlane.f32.xlu2 %v186_v6 }
 0x18f   :  { %v188_v8 = vpop.xlane.xlu2 %187 }
 0x190   :  { %v192_v9 = vperm.slane %v188_v8, 2  ;;  %v191_v10 = vperm.slane %v188_v8, 1  ;;  %v190_v11 = vperm.slane %v188_v8, 0  ;;  %v193_v17 = vperm.slane %v188_v8, 3 }
 0x191   :  { %v194_v20 = vperm.slane %v188_v8, 4  ;;  %v197_v21 = vperm.slane %v188_v8, 7  ;;  %v195_v32 = vperm.slane %v188_v8, 5  ;;  %v196_v35 = vperm.slane %v188_v8, 6 }
 0x192   :  { %v208_v12 = vsub.f32 %v146_v50, %v192_v9  ;;  %v207_v14 = vsub.f32 %v145_v41, %v191_v10  ;;  %v206_v15 = vsub.f32 %v144_v44, %v190_v11  ;;  %v209_v27 = vsub.f32 %v147_v49, %v193_v17 }
 0x193   :  { %v210_v28 = vsub.f32 %v148_v54, %v194_v20  ;;  %v213_v29 = vsub.f32 %v151_v0, %v197_v21  ;;  %v211_v40 = vsub.f32 %v149_v60, %v195_v32  ;;  %v212_v41 = vsub.f32 %v150_v57, %v196_v35 }
 0x194   :  { %v218_v22 = vmul.f32 1.442695, %v208_v12  ;;  %v216_v23 = vmul.f32 1.442695, %v207_v14  ;;  %v214_v25 = vmul.f32 1.442695, %v206_v15 }
 0x195   :  { %v220_v31 = vmul.f32 1.442695, %v209_v27  ;;  %v222_v34 = vmul.f32 1.442695, %v210_v28  ;;  %v228_v37 = vmul.f32 1.442695, %v213_v29 }
 0x196   :  { %642 = vpow2.f32 %v218_v22  ;;  %v224_v43 = vmul.f32 1.442695, %v211_v40  ;;  %v226_v44 = vmul.f32 1.442695, %v212_v41 }
 0x197   :  { %644 = vpow2.f32 %v216_v23 }
 0x198   :  { %646 = vpow2.f32 %v214_v25 }
 0x199   :  { %648 = vpow2.f32 %v220_v31 }
 0x19a   :  { %650 = vpow2.f32 %v222_v34 }
 0x19b   :  { %652 = vpow2.f32 %v228_v37 }
 0x19c   :  { %v858_v36 = vpop.eup %642  ;;  %654 = vpow2.f32 %v224_v43 }
 0x19d   :  { %v860_v38 = vpop.eup %644  ;;  %245 = vperm.xlu2 %640, %v858_v36   ;;  %656 = vpow2.f32 %v226_v44 }
 0x19e   :  { %v863_v39 = vpop.eup %646  ;;  %242 = vperm.xlu1 %639, %v860_v38  }
 0x19f   :  { %239 = vperm.xlu0 %638, %v863_v39   ;;  %v867_v45 = vpop.eup %648 }
 0x1a0   :  { %v869_v46 = vpop.eup %650 }
 0x1a1   :  { %v872_v47 = vpop.eup %652 }
 0x1a2   :  { %v876_v48 = vpop.eup %654 }
 0x1a3   :  { %v878_v49 = vpop.eup %656 }
 0x1a5   :  { %248 = vperm.xlu2 %640, %v867_v45  }
 0x1a6   :  { %251 = vperm.xlu1 %639, %v869_v46  }
 0x1a7   :  { %260 = vperm.xlu0 %638, %v872_v47  }
 0x1ad   :  { %254 = vperm.xlu2 %640, %v876_v48  }
 0x1ae   :  { %257 = vperm.xlu1 %639, %v878_v49  }
 0x1f7   :  { %v246_v50 = vpop.permute.xlu2 %245 }
 0x1f8   :  { %v264_v58 = vperm.slane %v246_v50, %v840_v42 }
 0x1ff   :  { %v249_v53 = vpop.permute.xlu2 %248 }
 0x200   :  { %v265_v61 = vperm.slane %v249_v53, %v840_v42 }
 0x207   :  { %v255_v62 = vpop.permute.xlu2 %254 }
 0x208   :  { %v267_v2 = vperm.slane %v255_v62, %v840_v42 }
 0x210   :  { %v243_v51 = vpop.permute.xlu1 %242 }
 0x211   :  { %v240_v52 = vpop.permute.xlu0 %239  ;;  %v263_v54 = vperm.slane %v243_v51, %v840_v42 }
 0x212   :  { %v262_v55 = vperm.slane %v240_v52, %v840_v42 }
 0x214   :  { %v270_v56 = vsel %vm170_vm5, %v263_v54, %v262_v55 }
 0x215   :  { %v271_v59 = vsel %vm172_vm6, %v264_v58, %v270_v56 }
 0x216   :  { %v272_v63 = vsel %vm174_vm10, %v265_v61, %v271_v59 }
 0x218   :  { %v252_v57 = vpop.permute.xlu1 %251 }
 0x219   :  { %v266_v60 = vperm.slane %v252_v57, %v840_v42  ;;  %v261_v1 = vpop.permute.xlu0 %260 }
 0x21a   :  { %v269_v5 = vperm.slane %v261_v1, %v840_v42 }
 0x21b   :  { %v273_v0 = vsel %vm176_vm12, %v266_v60, %v272_v63 }
 0x21c   :  { %v274_v6 = vsel %vm178_vm13, %v267_v2, %v273_v0 }
 0x220   :  { %v258_v3 = vpop.permute.xlu1 %257 }
 0x221   :  { %v268_v4 = vperm.slane %v258_v3, %v840_v42 }
 0x223   :  { %v275_v7 = vsel %vm1088_vm15, %v268_v4, %v274_v6 }
 0x224   :  { %v276_v8 = vsel %vm1087_vm2, %v269_v5, %v275_v7 }
 0x225   :  { %v278_v9 = vsel %vm1086_vm3, %v276_v8, 0.0 }
 0x226   :  { %279 = vadd.xlane.f32.xlu2 %v278_v9 }
 0x299   :  { %v280_v10 = vpop.xlane.xlu2 %279 }
 0x29a   :  { %v282_v11 = vperm.slane %v280_v10, 0  ;;  %v283_v12 = vperm.slane %v280_v10, 1  ;;  %v898_v14 = vperm.slane %v280_v10, 2  ;;  %v900_v15 = vperm.slane %v280_v10, 3 }
 0x29b   :  { %v902_v17 = vperm.slane %v280_v10, 4  ;;  %v904_v20 = vperm.slane %v280_v10, 5  ;;  %v910_v27 = vperm.slane %v280_v10, 7  ;;  %v912_v31 = vperm.slane %v280_v10, 6 }
 0x29c   :  { %658 = vrcp.f32 %v282_v11  ;;  %v322_v21 = vand.u32 2147483647, %v283_v12  ;;  %v324_v22 = vand.u32 2147483648, %v283_v12  ;;  %v307_v23 = vand.u32 2147483647, %v282_v11 }
 0x29d   :  { %660 = vrcp.f32 %v283_v12  ;;  %v309_v28 = vand.u32 2147483648, %v282_v11  ;;  %vm318_vm4 = vweird.f32 %v283_v12  ;;  %vm303_vm8 = vweird.f32 %v282_v11 }
 0x29e   :  { %662 = vrcp.f32 %v898_v14  ;;  %vm916_vm7 = vcmp.eq.f32.partialorder %v322_v21, 8.507059e+37  ;;  %v325_v41 = vor.u32 1.1754944e-38, %v324_v22  ;;  %vm922_vm9 = vcmp.eq.f32.partialorder %v307_v23, 8.507059e+37 }
 0x29f   :  { %664 = vrcp.f32 %v900_v15  ;;  %v310_v53 = vor.u32 1.1754944e-38, %v309_v28  ;;  %v354_v63 = vand.u32 2147483648, %v900_v15  ;;  %v339_v1 = vand.u32 2147483648, %v898_v14 }
 0x2a0   :  { %666 = vrcp.f32 %v902_v17  ;;  %v337_v22 = vand.u32 2147483647, %v898_v14 }
 0x2a1   :  { %668 = vrcp.f32 %v904_v20 }
 0x2a2   :  { %v659_v25 = vpop.eup %658  ;;  %670 = vrcp.f32 %v910_v27 }
 0x2a3   :  { %v661_v29 = vpop.eup %660  ;;  %v299_v32 = vmul.f32 %v659_v25, %v282_v11  ;;  %vm304_vm11 = vweird.f32 %v659_v25  ;;  %672 = vrcp.f32 %v912_v31 }
 0x2a4   :  { %v914_v34 = vpop.eup %662  ;;  %v314_v35 = vmul.f32 %v661_v29, %v283_v12  ;;  %vm319_vm14 = vweird.f32 %v661_v29  ;;  %vm305_vm0 = vmor %vm303_vm8, %vm304_vm11  ;;  %vm363_vm11 = vweird.f32 %v902_v17 }
 0x2a5   :  { %v920_v40 = vpop.eup %664  ;;  %v300_v43 = vsub.f32 1.0, %v299_v32  ;;  %v329_v50 = vmul.f32 %v914_v34, %v898_v14  ;;  %vm334_vm3 = vweird.f32 %v914_v34  ;;  %vm320_vm2 = vmor %vm318_vm4, %vm319_vm14  ;;  %vm348_vm4 = vweird.f32 %v900_v15 }
 0x2a6   :  { %v928_v51 = vpop.eup %666  ;;  %v315_v52 = vsub.f32 1.0, %v314_v35  ;;  %v344_v54 = vmul.f32 %v920_v40, %v900_v15  ;;  %vm349_vm15 = vweird.f32 %v920_v40  ;;  %v355_v35 = vor.u32 1.1754944e-38, %v354_v63 }
 0x2a7   :  { %v933_v55 = vpop.eup %668  ;;  %v301_v56 = vmul.f32 %v659_v25, %v300_v43  ;;  %v330_v57 = vsub.f32 1.0, %v329_v50  ;;  %v359_v58 = vmul.f32 %v928_v51, %v902_v17  ;;  %vm350_vm8 = vmor %vm348_vm4, %vm349_vm15  ;;  %vm364_vm15 = vweird.f32 %v928_v51 }
 0x2a8   :  { %v316_v59 = vmul.f32 %v661_v29, %v315_v52  ;;  %v345_v60 = vsub.f32 1.0, %v344_v54  ;;  %v374_v61 = vmul.f32 %v933_v55, %v904_v20  ;;  %v949_v7 = vpop.eup %670  ;;  %v369_v50 = vand.u32 2147483648, %v902_v17 }
 0x2a9   :  { %v302_v62 = vadd.f32 %v659_v25, %v301_v56  ;;  %v331_v0 = vmul.f32 %v914_v34, %v330_v57  ;;  %v360_v6 = vsub.f32 1.0, %v359_v58  ;;  %v367_v54 = vand.u32 2147483647, %v902_v17 }
 0x2aa   :  { %v317_v2 = vadd.f32 %v661_v29, %v316_v59  ;;  %v346_v3 = vmul.f32 %v920_v40, %v345_v60  ;;  %v375_v11 = vsub.f32 1.0, %v374_v61  ;;  %vm378_vm14 = vweird.f32 %v904_v20 }
 0x2ab   :  { %v306_v4 = vsel %vm305_vm0, %v659_v25, %v302_v62  ;;  %v332_v5 = vadd.f32 %v914_v34, %v331_v0  ;;  %vm333_vm0 = vweird.f32 %v898_v14  ;;  %v352_v25 = vand.u32 2147483647, %v900_v15 }
 0x2ac   :  { %v321_v8 = vsel %vm320_vm2, %v661_v29, %v317_v2  ;;  %v311_v9 = vsel %vm922_vm9, %v310_v53, %v306_v4  ;;  %v347_v10 = vadd.f32 %v920_v40, %v346_v3  ;;  %vm335_vm2 = vmor %vm333_vm0, %vm334_vm3  ;;  %v968_v29 = vpop.eup %672  ;;  %v340_v14 = vor.u32 1.1754944e-38, %v339_v1 }
 0x2ad   :  { %v326_v21 = vsel %vm916_vm7, %v325_v41, %v321_v8  ;;  %v312_v12 = vmul.f32 %v863_v39, %v311_v9  ;;  %v336_v28 = vsel %vm335_vm2, %v914_v34, %v332_v5  ;;  %v361_v39 = vmul.f32 %v928_v51, %v360_v6  ;;  %vm365_vm0 = vmor %vm363_vm11, %vm364_vm15 }
 0x2ae   :  { %v327_v23 = vmul.f32 %v860_v38, %v326_v21  ;;  %v351_v38 = vsel %vm350_vm8, %v920_v40, %v347_v10  ;;  %v376_v32 = vmul.f32 %v933_v55, %v375_v11  ;;  %v404_v15 = vmul.f32 %v949_v7, %v910_v27 }
 0x2af   :  { %420 = vperm.xlu1 %639, %v312_v12   ;;  %vm338_vm3 = vcmp.eq.f32.partialorder %v337_v22, 8.507059e+37  ;;  %vm353_vm7 = vcmp.eq.f32.partialorder %v352_v25, 8.507059e+37  ;;  %v384_v41 = vand.u32 2147483648, %v904_v20  ;;  %v362_v43 = vadd.f32 %v928_v51, %v361_v39 }
 0x2b0   :  { %425 = vperm.xlu0 %638, %v327_v23   ;;  %v341_v37 = vsel %vm338_vm3, %v340_v14, %v336_v28  ;;  %v356_v34 = vsel %vm353_vm7, %v355_v35, %v351_v38  ;;  %v389_v40 = vmul.f32 %v968_v29, %v912_v31  ;;  %v377_v44 = vadd.f32 %v933_v55, %v376_v32  ;;  %v526_v32 = vld [vmem:[%s1082_s3 + $0x20] sm:$0xff] }
 0x2b1   :  { %vm379_vm9 = vweird.f32 %v933_v55  ;;  %v405_v52 = vsub.f32 1.0, %v404_v15  ;;  %v342_v53 = vmul.f32 %v858_v36, %v341_v37  ;;  %v357_v57 = vmul.f32 %v867_v45, %v356_v34 }
 0x2b2   :  { %v390_v56 = vsub.f32 1.0, %v389_v40  ;;  %v382_v58 = vand.u32 2147483647, %v904_v20  ;;  %vm380_vm4 = vmor %vm378_vm14, %vm379_vm9  ;;  %v366_v59 = vsel %vm365_vm0, %v928_v51, %v362_v43  ;;  %v370_v61 = vor.u32 1.1754944e-38, %v369_v50  ;;  %v525_v43 = vld [vmem:[%s1082_s3 + $0x18] sm:$0xff] }
 0x2b3   :  { %v381_v36 = vsel %vm380_vm4, %v933_v55, %v377_v44  ;;  %v406_v17 = vmul.f32 %v949_v7, %v405_v52  ;;  %v385_v62 = vor.u32 1.1754944e-38, %v384_v41  ;;  %vm368_vm2 = vcmp.eq.f32.partialorder %v367_v54, 8.507059e+37  ;;  %v524_v52 = vld [vmem:[%s1082_s3 + $0x10] sm:$0xff] }
 0x2b4   :  { %v391_v60 = vmul.f32 %v968_v29, %v390_v56  ;;  %vm383_vm8 = vcmp.eq.f32.partialorder %v382_v58, 8.507059e+37  ;;  %v371_v45 = vsel %vm368_vm2, %v370_v61, %v366_v59  ;;  %vm394_vm3 = vweird.f32 %v968_v29  ;;  %v523_v59 = vld [vmem:[%s1082_s3 + $0x8] sm:$0xff] }
 0x2b5   :  { %v386_v63 = vsel %vm383_vm8, %v385_v62, %v381_v36  ;;  %v407_v0 = vadd.f32 %v949_v7, %v406_v17  ;;  %vm409_vm7 = vweird.f32 %v949_v7  ;;  %v399_v51 = vand.u32 2147483648, %v912_v31 }
 0x2b6   :  { %v392_v20 = vadd.f32 %v968_v29, %v391_v60  ;;  %v372_v55 = vmul.f32 %v869_v46, %v371_v45  ;;  %v414_v1 = vand.u32 2147483648, %v910_v27  ;;  %vm393_vm15 = vweird.f32 %v912_v31 }
 0x2b7   :  { %430 = vperm.xlu1 %639, %v342_v53   ;;  %v397_v2 = vand.u32 2147483647, %v912_v31  ;;  %v387_v3 = vmul.f32 %v876_v48, %v386_v63  ;;  %vm408_vm9 = vweird.f32 %v910_v27  ;;  %v412_v4 = vand.u32 2147483647, %v910_v27  ;;  %vm395_vm11 = vmor %vm393_vm15, %vm394_vm3 }
 0x2b8   :  { %435 = vperm.xlu0 %638, %v357_v57   ;;  %vm410_vm14 = vmor %vm408_vm9, %vm409_vm7  ;;  %v396_v5 = vsel %vm395_vm11, %v968_v29, %v392_v20  ;;  %v400_v6 = vor.u32 1.1754944e-38, %v399_v51  ;;  %v415_v8 = vor.u32 1.1754944e-38, %v414_v1  ;;  %vm1093_vm2 = vcmask 1046534  }
 0x2b9   :  { %v411_v46 = vsel %vm410_vm14, %v949_v7, %v407_v0  ;;  %vm398_vm0 = vcmp.eq.f32.partialorder %v397_v2, 8.507059e+37  ;;  %vm413_vm4 = vcmp.eq.f32.partialorder %v412_v4, 8.507059e+37  ;;  %v522_v0 = vld [vmem:[%s1082_s3] sm:$0xff]  ;;  %vm1094_vm8 = vcmask 1047559  }
 0x2ba   :  { %v401_v9 = vsel %vm398_vm0, %v400_v6, %v396_v5  ;;  %v416_v31 = vsel %vm413_vm4, %v415_v8, %v411_v46  ;;  %vm1095_vm3 = vcmask 64512   ;;  %vm1097_vm7 = vmmov %vm1094_vm8 }
 0x2bb   :  { %v402_v48 = vmul.f32 %v878_v49, %v401_v9  ;;  %v417_v10 = vmul.f32 %v872_v47, %v416_v31  ;;  %v529_v49 = vld [vmem:[%s1082_s3 + $0x38] sm:$0xff]  ;;  %v528_v47 = vld [vmem:[%s1082_s3 + $0x30] sm:$0xff] }
 0x2bc   :  { %555 = vmatpush.msra.mxu1 %v529_v49 }
 0x2be   :  { %556 = vmatpush.msra.mxu1 %v528_v47 }
 0x2bf   :  { %440 = vperm.xlu1 %639, %v372_v55  }
 0x2c0   :  { %445 = vperm.xlu0 %638, %v387_v3  }
 0x2c7   :  { %450 = vperm.xlu1 %639, %v402_v48  }
 0x2c8   :  { %455 = vperm.xlu0 %638, %v417_v10  }
 0x321   :  { %v421_v27 = vpop.permute.xlu1 %420 }
 0x322   :  { %v426_v11 = vpop.permute.xlu0 %425  ;;  %v458_v21 = vmul.f32 %v421_v27, %v808_v13 }
 0x323   :  { %v459_v12 = vmul.f32 %v426_v11, %v815_v18  ;;  %v527_v18 = vld [vmem:[%s1082_s3 + $0x28] sm:$0xff]  ;;  %s729_s3 = smov [#allocation4]  }
 0x324   :  { %v466_v7 = vsel %vm111_vm1, %v458_v21, 0.0  ;;  %557 = vmatpush.msra.mxu1 %v527_v18  ;;  %s602_s1 = sshll.u32 %s729_s3, 4  ;;  %s603_s1 = int_to_ptr.vmem [resolvable:$true] %s602_s1 }
 0x325   :  { %v473_v22 = vsel %vm111_vm1, %v459_v12, 0.0  ;;  %v467_v23 = vrot.slane %v466_v7, 4 }
 0x326   :  { %v474_v25 = vrot.slane %v473_v22, 4  ;;  %558 = vmatpush.msra.mxu1 %v526_v32 }
 0x327   :  { %v468_v39 = vadd.f32 %v467_v23, %v466_v7 }
 0x328   :  { %v475_v28 = vadd.f32 %v474_v25, %v473_v22  ;;  %559 = vmatpush.msra.mxu1 %v525_v43 }
 0x329   :  { %v431_v13 = vpop.permute.xlu1 %430  ;;  %v469_v37 = vrot.slane %v468_v39, 2 }
 0x32a   :  { %v436_v29 = vpop.permute.xlu0 %435  ;;  %v460_v38 = vmul.f32 %v431_v13, %v826_v26  ;;  %v476_v35 = vrot.slane %v475_v28, 2  ;;  %v570_v26 = vperm.slane %v426_v11, %v840_v42  ;;  %v571_v50 = vperm.slane %v431_v13, %v840_v42  ;;  %560 = vmatpush.msra.mxu1 %v524_v52 }
 0x32b   :  { %v461_v14 = vmul.f32 %v436_v29, %v812_v16  ;;  %v569_v16 = vperm.slane %v421_v27, %v840_v42  ;;  %v470_v56 = vadd.f32 %v469_v37, %v468_v39  ;;  %v572_v36 = vperm.slane %v436_v29, %v840_v42 }
 0x32c   :  { %v480_v15 = vsel %vm111_vm1, %v460_v38, 0.0  ;;  %v477_v54 = vadd.f32 %v476_v35, %v475_v28  ;;  %561 = vmatpush.msra.mxu1 %v523_v59 }
 0x32d   :  { %v487_v41 = vsel %vm111_vm1, %v461_v14, 0.0  ;;  %v481_v34 = vrot.slane %v480_v15, 4  ;;  %v577_v60 = vsel %vm170_vm5, %v570_v26, %v569_v16  ;;  %v471_v2 = vrot.slane %v470_v56, 1 }
 0x32e   :  { %v488_v40 = vrot.slane %v487_v41, 4  ;;  %v578_v45 = vsel %vm172_vm6, %v571_v50, %v577_v60  ;;  %v478_v1 = vrot.slane %v477_v54, 1  ;;  %562 = vmatpush.msra.mxu1 %v522_v0 }
 0x32f   :  { %v482_v44 = vadd.f32 %v481_v34, %v480_v15  ;;  %v472_v10 = vadd.f32 %v471_v2, %v470_v56 }
 0x330   :  { %v489_v53 = vadd.f32 %v488_v40, %v487_v41  ;;  %v479_v48 = vadd.f32 %v478_v1, %v477_v54 }
 0x331   :  { %v483_v57 = vrot.slane %v482_v44, 2  ;;  %v441_v58 = vpop.permute.xlu1 %440 }
 0x332   :  { %v446_v61 = vpop.permute.xlu0 %445  ;;  %v462_v17 = vmul.f32 %v441_v58, %v823_v24  ;;  %v490_v62 = vrot.slane %v489_v53, 2  ;;  %v573_v20 = vperm.slane %v441_v58, %v840_v42 }
 0x333   :  { %v463_v63 = vmul.f32 %v446_v61, %v835_v33  ;;  %v484_v51 = vadd.f32 %v483_v57, %v482_v44  ;;  %v574_v5 = vperm.slane %v446_v61, %v840_v42  ;;  %v579_v33 = vsel %vm174_vm10, %v572_v36, %v578_v45 }
 0x334   :  { %v494_v55 = vsel %vm111_vm1, %v462_v17, 0.0  ;;  %v491_v46 = vadd.f32 %v490_v62, %v489_v53  ;;  %v580_v8 = vsel %vm176_vm12, %v573_v20, %v579_v33 }
 0x335   :  { %v501_v24 = vsel %vm111_vm1, %v463_v63, 0.0  ;;  %v495_v3 = vrot.slane %v494_v55, 4  ;;  %v485_v9 = vrot.slane %v484_v51, 1  ;;  %v581_v7 = vsel %vm178_vm13, %v574_v5, %v580_v8 }
 0x336   :  { %v502_v4 = vrot.slane %v501_v24, 4  ;;  %v492_v25 = vrot.slane %v491_v46, 1 }
 0x337   :  { %v496_v6 = vadd.f32 %v495_v3, %v494_v55  ;;  %v486_v39 = vadd.f32 %v485_v9, %v484_v51 }
 0x338   :  { %v503_v31 = vadd.f32 %v502_v4, %v501_v24  ;;  %v493_v37 = vadd.f32 %v492_v25, %v491_v46 }
 0x339   :  { %v497_v27 = vrot.slane %v496_v6, 2  ;;  %v451_v11 = vpop.permute.xlu1 %450 }
 0x33a   :  { %v504_v21 = vrot.slane %v503_v31, 2  ;;  %v456_v12 = vpop.permute.xlu0 %455  ;;  %v464_v22 = vmul.f32 %v451_v11, %v817_v19  ;;  %v575_v23 = vperm.slane %v451_v11, %v840_v42 }
 0x33b   :  { %v498_v49 = vadd.f32 %v497_v27, %v496_v6  ;;  %v465_v47 = vmul.f32 %v456_v12, %v831_v30  ;;  %v576_v28 = vperm.slane %v456_v12, %v840_v42  ;;  %v538_v30 = vsel %vm170_vm5, %v479_v48, %v472_v10  ;;  %vm1096_vm5 = vmmov %vm1093_vm2 }
 0x33c   :  { %v505_v13 = vadd.f32 %v504_v21, %v503_v31  ;;  %v508_v18 = vsel %vm111_vm1, %v464_v22, 0.0  ;;  %v582_v29 = vsel %vm1093_vm2, %v575_v23, %v581_v7  ;;  %v539_v26 = vsel %vm172_vm6, %v486_v39, %v538_v30 }
 0x33d   :  { %v499_v38 = vrot.slane %v498_v49, 1  ;;  %v515_v14 = vsel %vm111_vm1, %v465_v47, 0.0  ;;  %v509_v32 = vrot.slane %v508_v18, 4  ;;  %v583_v19 = vsel %vm1094_vm8, %v576_v28, %v582_v29 }
 0x33e   :  { %v516_v15 = vrot.slane %v515_v14, 4  ;;  %585 = vst.msk [vmem:[#allocation4] sm:$0xff] %vm1095_vm3, %v583_v19  ;;  %v506_v42 = vrot.slane %v505_v13, 1  ;;  %v540_v52 = vsel %vm174_vm10, %v493_v37, %v539_v26 }
 0x33f   :  { %v510_v35 = vadd.f32 %v509_v32, %v508_v18  ;;  %v500_v34 = vadd.f32 %v499_v38, %v498_v49  ;;  %607 = dma.vmem_to_hbm [thread:$0]  %s603_s1, 128, %s605_s9, [#allocation5]  }
 0x340   :  { %v517_v41 = vadd.f32 %v516_v15, %v515_v14  ;;  %v507_v44 = vadd.f32 %v506_v42, %v505_v13 }
 0x341   :  { %v511_v43 = vrot.slane %v510_v35, 2  ;;  %v541_v54 = vsel %vm176_vm12, %v500_v34, %v540_v52 }
 0x342   :  { %v518_v16 = vrot.slane %v517_v41, 2  ;;  %v542_v59 = vsel %vm178_vm13, %v507_v44, %v541_v54 }
 0x343   :  { %v512_v40 = vadd.f32 %v511_v43, %v510_v35 }
 0x344   :  { %v519_v50 = vadd.f32 %v518_v16, %v517_v41 }
 0x345   :  { %v513_v53 = vrot.slane %v512_v40, 1 }
 0x346   :  { %v520_v56 = vrot.slane %v519_v50, 1 }
 0x347   :  { %v514_v57 = vadd.f32 %v513_v53, %v512_v40 }
 0x348   :  { %v521_v58 = vadd.f32 %v520_v56, %v519_v50 }
 0x349   :  { %v543_v60 = vsel %vm1096_vm5, %v514_v57, %v542_v59 }
 0x34a   :  { %v544_v36 = vsel %vm1097_vm7, %v521_v58, %v543_v60 }
 0x34b   :  { %626 = vmatmul.msk.f32.vlgmr.msra.gmra.mxu1 %vm111_vm1, %v544_v36  ;;  %vm1098_vm1 = vcmask 261120  }
 0x3c8   :  { %v564_v61 = vpop.f32.mrf.mxu1 }
 0x3c9   :  { %674 = vtanh.f32 %v564_v61 }
 0x3cf   :  { %v675_v17 = vpop.eup %674 }
 0x3d0   :  { %568 = vst.msk [vmem:[#allocation2] sm:$0xff] %vm1098_vm1, %v675_v17 }
 0x3d1   :  { %596 = dma.vmem_to_hbm [thread:$0]  %s592_s11, 128, %s594_s14, [#allocation3]  }
 0x3d2   :  { %724 = dma.done.wait [#allocation3], 128  }
 0x3d3   :  { %725 = vsyncadd [#allocation3], 4294967168 }
 0x3d4   :  { %726 = dma.done.wait [#allocation5], 128  }
 0x3d5   :  { %727 = vsyncadd [#allocation5], 4294967168 }
 0x3d6   :  { %616 = vsyncpa [#allocation3], 1 }
 0x3d7   :  { %617 = vsyncpa [#allocation5], 1 }

</bundles_post_ra>
